<compile_context>
chip_gen: v7x
topology: tpu7x:2x2x1
jax: 0.10.0
libtpu: 0.0.40
codegen_flags: <defaults>
</compile_context>

<pallas_src>
import jax
import jax.numpy as jnp
from jax.experimental import pallas as pl
from jax.experimental.pallas import tpu as pltpu


def _round_up(n: int, m: int) -> int:
    return ((n + m - 1) // m) * m


def mlp_kernel(x_ref, w1_ref, b1_ref, w2_ref, b2_ref, o_ref, h_acc):
    """One (batch-tile, k-tile) grid step of relu(x@W1+b1)@W2+b2."""
    k = pl.program_id(1)

    # Partial first matmul on the MXU: bf16 x bf16 -> f32 accumulate.
    part = jnp.dot(x_ref[...], w1_ref[...], preferred_element_type=jnp.float32)

    @pl.when(k == 0)
    def _():
        h_acc[...] = part

    @pl.when(k > 0)
    def _():
        h_acc[...] += part

    # Last K step: bias + ReLU in f32 on the VPU (safe on v5e, no bf16 VPU),
    # second matmul on the MXU, then the (lane-dense) output store.
    @pl.when(k == pl.num_programs(1) - 1)
    def _():
        h = jnp.maximum(h_acc[...] + b1_ref[...], 0.0)
        out = jnp.dot(h.astype(w2_ref.dtype), w2_ref[...],
                      preferred_element_type=jnp.float32)
        o_ref[...] = (out + b2_ref[...]).astype(o_ref.dtype)


def make_audio_text_classifier(w1, b1, w2, b2, *, tile_b=512,
                               param_dtype=jnp.bfloat16,
                               out_dtype=jnp.float32,
                               use_pallas=None):
    """Returns a jitted forward(x) for AudioTextClassifier.

    w1: (hidden, input_dim), b1: (hidden,), w2: (num_classes, hidden),
    b2: (num_classes,)  -- PyTorch nn.Linear layout.
    All padding / casts of the parameters happen here, once.
    """
    H, D_in = w1.shape
    C, H2 = w2.shape
    assert H2 == H and b1.shape == (H,) and b2.shape == (C,)

    # Lane-dense (128-padded) feature dims.
    Dp = _round_up(D_in, 128)
    Hp = _round_up(H, 128)
    Cp = _round_up(C, 128)

    # K-tiling over input_dim: keep each W1 block within a VMEM budget instead
    # of forcing the whole W1 resident (matters for large D_in on v7x/v5e).
    pbytes = jnp.dtype(param_dtype).itemsize
    w1_block_budget = 8 * 1024 * 1024  # bytes per W1 block
    tk = min(Dp, max(128, (w1_block_budget // (Hp * pbytes)) // 128 * 128))
    nk = pl.cdiv(Dp, tk)
    Dp = nk * tk  # Dp is an exact multiple of tk (extra zero-padding is inert)

    # One-time padded / transposed / cast parameters (kernel layout [in, out]).
    # Zero-padded rows/cols contribute exactly 0, so results match unpadded math.
    w1_p = jnp.zeros((Dp, Hp), param_dtype).at[:D_in, :H].set(
        w1.T.astype(param_dtype))
    w2_p = jnp.zeros((Hp, Cp), param_dtype).at[:H, :C].set(
        w2.T.astype(param_dtype))
    b1_p = jnp.zeros((1, Hp), jnp.float32).at[0, :H].set(b1.astype(jnp.float32))
    b2_p = jnp.zeros((1, Cp), jnp.float32).at[0, :C].set(b2.astype(jnp.float32))

    out_bytes = jnp.dtype(out_dtype).itemsize

    def forward(x):
        B = x.shape[0]
        assert x.shape == (B, D_in)

        # Tiny problems: launch + padding overhead dominates -> plain XLA path.
        flops = 2 * B * (D_in * H + H * C)
        if use_pallas is False or (use_pallas is None and flops < (1 << 22)):
            h = jnp.maximum(x @ w1.T + b1, 0.0)
            return (h @ w2.T + b2).astype(x.dtype)

        # Balanced batch blocks, multiples of 16 (bf16 sublane packing); use at
        # least 2 blocks when possible so v7x's 2 TensorCores both get work.
        nb = pl.cdiv(B, tile_b)
        if nb == 1 and B > 16:
            nb = 2
        tb = _round_up(pl.cdiv(B, nb), 16)
        Bp = nb * tb

        # Pad / cast x only when actually necessary (avoids an extra HBM copy
        # of the activations for already-aligned shapes).
        if (Bp != B) or (Dp != D_in):
            x_p = jnp.zeros((Bp, Dp), param_dtype).at[:B, :D_in].set(
                x.astype(param_dtype))
        else:
            x_p = x.astype(param_dtype)

        # VMEM footprint of one grid step: double-buffered x/out (+W1 when
        # K-tiled), single-buffered resident weights, f32 hidden accumulator.
        vmem_needed = (tb * tk * pbytes * 2
                       + tk * Hp * pbytes * (1 if nk == 1 else 2)
                       + Hp * Cp * pbytes
                       + (Hp + Cp) * 4
                       + tb * Cp * out_bytes * 2
                       + tb * Hp * 4)
        compiler_kwargs = dict(dimension_semantics=("parallel", "arbitrary"))
        if vmem_needed > 12 * 1024 * 1024:
            compiler_kwargs["vmem_limit_bytes"] = int(
                min(max(int(vmem_needed * 1.5), 32 * 1024 * 1024),
                    64 * 1024 * 1024))

        cost = pl.CostEstimate(
            flops=2 * Bp * (Dp * Hp + Hp * Cp),
            transcendentals=0,
            bytes_accessed=(Bp * Dp * pbytes + Dp * Hp * pbytes
                            + Hp * Cp * pbytes + (Hp + Cp) * 4
                            + Bp * Cp * out_bytes),
        )

        resident = pl.Buffered(1)          # constant index_map -> one DMA, 1 buf
        w1_mode = resident if nk == 1 else None

        out_p = pl.pallas_call(
            mlp_kernel,
            out_shape=jax.ShapeDtypeStruct((Bp, Cp), out_dtype),
            grid=(nb, nk),
            in_specs=[
                pl.BlockSpec((tb, tk), lambda i, k: (i, k)),            # x
                pl.BlockSpec((tk, Hp), lambda i, k: (k, 0),
                             pipeline_mode=w1_mode),                    # w1
                pl.BlockSpec((1, Hp), lambda i, k: (0, 0),
                             pipeline_mode=resident),                   # b1
                pl.BlockSpec((Hp, Cp), lambda i, k: (0, 0),
                             pipeline_mode=resident),                   # w2
                pl.BlockSpec((1, Cp), lambda i, k: (0, 0),
                             pipeline_mode=resident),                   # b2
            ],
            out_specs=pl.BlockSpec((tb, Cp), lambda i, k: (i, 0)),
            scratch_shapes=[pltpu.VMEM((tb, Hp), jnp.float32)],          # hidden acc
            compiler_params=pltpu.CompilerParams(**compiler_kwargs),
            cost_estimate=cost,
        )(x_p, w1_p, b1_p, w2_p, b2_p)

        # Slice padding off and return in the caller's dtype.
        return out_p[:B, :C].astype(x.dtype)

    return jax.jit(forward)


if __name__ == "__main__":
    # Small shapes consistent with the module: batch=8, input_dim=32,
    # hidden_dim=64, num_classes=16.
    B, D_IN, HIDDEN, N_CLASSES = 8, 32, 64, 16

    key = jax.random.PRNGKey(0)
    kx, kw1, kb1, kw2, kb2 = jax.random.split(key, 5)

    x = jax.random.normal(kx, (B, D_IN), dtype=jnp.float32)

    # Parameters in PyTorch nn.Linear layout: weight (out, in), bias (out,).
    w1 = jax.random.normal(kw1, (HIDDEN, D_IN), dtype=jnp.float32) * 0.1
    b1 = jax.random.normal(kb1, (HIDDEN,), dtype=jnp.float32) * 0.1
    w2 = jax.random.normal(kw2, (N_CLASSES, HIDDEN), dtype=jnp.float32) * 0.1
    b2 = jax.random.normal(kb2, (N_CLASSES,), dtype=jnp.float32) * 0.1

    # Force the Pallas path so the kernel is exercised even at demo size
    # (the auto-dispatch would fall back to plain XLA for shapes this tiny).
    forward = make_audio_text_classifier(w1, b1, w2, b2, use_pallas=True)

    out = forward(x)
    jax.block_until_ready(out)

    # Pure-JAX f32 reference of the forward semantics (kernel uses bf16 MXU
    # inputs with f32 accumulation -> relaxed tolerance).
    ref = jnp.maximum(x @ w1.T + b1, 0.0) @ w2.T + b2
    assert out.shape == (B, N_CLASSES)
    assert jnp.allclose(out, ref, atol=3e-2, rtol=3e-2), (
        float(jnp.max(jnp.abs(out - ref))))

    print("KERNEL_OK")
</pallas_src>

<mosaic_0001>
module attributes {stable_mosaic.version = 11 : i64} {
  func.func @mlp_kernel(%arg0: i32, %arg1: i32, %arg2: memref<16x128xbf16, #tpu.memory_space<vmem>>, %arg3: memref<128x128xbf16, #tpu.memory_space<vmem>>, %arg4: memref<1x128xf32, #tpu.memory_space<vmem>>, %arg5: memref<128x128xbf16, #tpu.memory_space<vmem>>, %arg6: memref<1x128xf32, #tpu.memory_space<vmem>>, %arg7: memref<16x128xf32, #tpu.memory_space<vmem>>, %arg8: memref<16x128xf32, #tpu.memory_space<vmem>>) attributes {dimension_semantics = [#tpu.dimension_semantics<parallel>, #tpu.dimension_semantics<arbitrary>], iteration_bounds = array<i64: 1, 1>, scalar_prefetch = 0 : i64, scratch_operands = 1 : i64, tpu.core_type = #tpu.core_type<tc>, window_params = [{transform_indices = @transform_0, window_bounds = array<i64: 16, 128>}, {pipeline_mode = #tpu.pipeline_mode<synchronous>, transform_indices = @transform_1, window_bounds = array<i64: 128, 128>}, {pipeline_mode = #tpu.pipeline_mode<synchronous>, transform_indices = @transform_2, window_bounds = array<i64: 1, 128>}, {pipeline_mode = #tpu.pipeline_mode<synchronous>, transform_indices = @transform_3, window_bounds = array<i64: 128, 128>}, {pipeline_mode = #tpu.pipeline_mode<synchronous>, transform_indices = @transform_4, window_bounds = array<i64: 1, 128>}, {transform_indices = @transform_5, window_bounds = array<i64: 16, 128>}]} {
    %c0 = arith.constant 0 : index
    %c0_0 = arith.constant 0 : index
    %0 = vector.load %arg2[%c0, %c0_0] : memref<16x128xbf16, #tpu.memory_space<vmem>>, vector<16x128xbf16>
    %c0_1 = arith.constant 0 : index
    %c0_2 = arith.constant 0 : index
    %1 = vector.load %arg3[%c0_1, %c0_2] : memref<128x128xbf16, #tpu.memory_space<vmem>>, vector<128x128xbf16>
    %cst = arith.constant dense<0.000000e+00> : vector<16x128xf32>
    %2 = tpu.matmul %0, %1, %cst {dimension_numbers = #tpu.dot_dimension_numbers<[1], [0], [0], [1], [0, 0, 1, 1], [], []>} : vector<16x128xbf16>, vector<128x128xbf16>, vector<16x128xf32> -> vector<16x128xf32>
    %c0_i32 = arith.constant 0 : i32
    %3 = arith.cmpi eq, %arg1, %c0_i32 : i32
    %4 = arith.extui %3 : i1 to i32
    %c0_i32_3 = arith.constant 0 : i32
    %5 = arith.cmpi ne, %4, %c0_i32_3 : i32
    scf.if %5 {
      %c0_8 = arith.constant 0 : index
      %c0_9 = arith.constant 0 : index
      %12 = vector.load %arg8[%c0_8, %c0_9] : memref<16x128xf32, #tpu.memory_space<vmem>>, vector<16x128xf32>
      tpu.vector_store %arg8[%c0_8, %c0_9], %2 {strides = array<i32>} : memref<16x128xf32, #tpu.memory_space<vmem>>, vector<16x128xf32>,
    } else {
    }
    %c0_i32_4 = arith.constant 0 : i32
    %6 = arith.cmpi sgt, %arg1, %c0_i32_4 : i32
    %7 = arith.extui %6 : i1 to i32
    %c0_i32_5 = arith.constant 0 : i32
    %8 = arith.cmpi ne, %7, %c0_i32_5 : i32
    scf.if %8 {
      %c0_8 = arith.constant 0 : index
      %c0_9 = arith.constant 0 : index
      %12 = vector.load %arg8[%c0_8, %c0_9] : memref<16x128xf32, #tpu.memory_space<vmem>>, vector<16x128xf32>
      %13 = arith.addf %12, %2 : vector<16x128xf32>
      %c0_10 = arith.constant 0 : index
      %c0_11 = arith.constant 0 : index
      %14 = vector.load %arg8[%c0_10, %c0_11] : memref<16x128xf32, #tpu.memory_space<vmem>>, vector<16x128xf32>
      tpu.vector_store %arg8[%c0_10, %c0_11], %13 {strides = array<i32>} : memref<16x128xf32, #tpu.memory_space<vmem>>, vector<16x128xf32>,
    } else {
    }
    %c0_i32_6 = arith.constant 0 : i32
    %9 = arith.cmpi eq, %arg1, %c0_i32_6 : i32
    %10 = arith.extui %9 : i1 to i32
    %c0_i32_7 = arith.constant 0 : i32
    %11 = arith.cmpi ne, %10, %c0_i32_7 : i32
    scf.if %11 {
      %c0_8 = arith.constant 0 : index
      %c0_9 = arith.constant 0 : index
      %12 = vector.load %arg8[%c0_8, %c0_9] : memref<16x128xf32, #tpu.memory_space<vmem>>, vector<16x128xf32>
      %c0_10 = arith.constant 0 : index
      %c0_11 = arith.constant 0 : index
      %13 = vector.load %arg4[%c0_10, %c0_11] : memref<1x128xf32, #tpu.memory_space<vmem>>, vector<1x128xf32>
      %14 = vector.broadcast %13 : vector<1x128xf32> to vector<16x128xf32>
      %15 = arith.addf %12, %14 : vector<16x128xf32>
      %cst_12 = arith.constant 0.000000e+00 : f32
      %16 = vector.broadcast %cst_12 : f32 to vector<16x128xf32>
      %17 = arith.maximumf %15, %16 : vector<16x128xf32>
      %18 = arith.truncf %17 : vector<16x128xf32> to vector<16x128xbf16>
      %c0_13 = arith.constant 0 : index
      %c0_14 = arith.constant 0 : index
      %19 = vector.load %arg5[%c0_13, %c0_14] : memref<128x128xbf16, #tpu.memory_space<vmem>>, vector<128x128xbf16>
      %cst_15 = arith.constant dense<0.000000e+00> : vector<16x128xf32>
      %20 = tpu.matmul %18, %19, %cst_15 {dimension_numbers = #tpu.dot_dimension_numbers<[1], [0], [0], [1], [0, 0, 1, 1], [], []>} : vector<16x128xbf16>, vector<128x128xbf16>, vector<16x128xf32> -> vector<16x128xf32>
      %c0_16 = arith.constant 0 : index
      %c0_17 = arith.constant 0 : index
      %21 = vector.load %arg6[%c0_16, %c0_17] : memref<1x128xf32, #tpu.memory_space<vmem>>, vector<1x128xf32>
      %22 = vector.broadcast %21 : vector<1x128xf32> to vector<16x128xf32>
      %23 = arith.addf %20, %22 : vector<16x128xf32>
      %c0_18 = arith.constant 0 : index
      %c0_19 = arith.constant 0 : index
      %24 = vector.load %arg7[%c0_18, %c0_19] : memref<16x128xf32, #tpu.memory_space<vmem>>, vector<16x128xf32>
      tpu.vector_store %arg7[%c0_18, %c0_19], %23 {strides = array<i32>} : memref<16x128xf32, #tpu.memory_space<vmem>>, vector<16x128xf32>,
    } else {
    }
    return
  }
  func.func @transform_0(%arg0: i32, %arg1: i32) -> (i32, i32) {
    %c0_i32 = arith.constant 0 : i32
    return %arg0, %arg1 : i32, i32
  }
  func.func @transform_1(%arg0: i32, %arg1: i32) -> (i32, i32) {
    %c0_i32 = arith.constant 0 : i32
    %c0_i32_0 = arith.constant 0 : i32
    return %arg1, %c0_i32 : i32, i32
  }
  func.func @transform_2(%arg0: i32, %arg1: i32) -> (i32, i32) {
    %c0_i32 = arith.constant 0 : i32
    %c0_i32_0 = arith.constant 0 : i32
    %c0_i32_1 = arith.constant 0 : i32
    return %c0_i32, %c0_i32_0 : i32, i32
  }
  func.func @transform_3(%arg0: i32, %arg1: i32) -> (i32, i32) {
    %c0_i32 = arith.constant 0 : i32
    %c0_i32_0 = arith.constant 0 : i32
    %c0_i32_1 = arith.constant 0 : i32
    return %c0_i32, %c0_i32_0 : i32, i32
  }
  func.func @transform_4(%arg0: i32, %arg1: i32) -> (i32, i32) {
    %c0_i32 = arith.constant 0 : i32
    %c0_i32_0 = arith.constant 0 : i32
    %c0_i32_1 = arith.constant 0 : i32
    return %c0_i32, %c0_i32_0 : i32, i32
  }
  func.func @transform_5(%arg0: i32, %arg1: i32) -> (i32, i32) {
    %c0_i32 = arith.constant 0 : i32
    %c0_i32_0 = arith.constant 0 : i32
    return %arg0, %c0_i32 : i32, i32
  }
}

</mosaic_0001>

<bundles_post_ra>
// kernel: forward.1
= control target key start
LH: loop header
LB: loop body
LE: loop exit
PB: predicated region body
PF: predicated region fallthrough
CT: control target
= control target key end

     0   :  { %10 = vsyncpa [#allocation4], 0  ;;  %s538_s0 = inlined_call_operand.vmem [shape: bf16[16,128], index: 0, kind: input, shape index: {}]   ;;  %s539_s1 = inlined_call_operand.hbm [shape: bf16[128,128], index: 1, kind: input, shape index: {}]   ;;  %s540_s2 = inlined_call_operand.vmem [shape: f32[1,128], index: 2, kind: input, shape index: {}]   ;;  %s541_s3 = inlined_call_operand.hbm [shape: bf16[128,128], index: 3, kind: input, shape index: {}]   ;;  %s542_s4 = inlined_call_operand.vmem [shape: f32[1,128], index: 4, kind: input, shape index: {}]   ;;  %s543_s5 = inlined_call_operand.vmem [shape: f32[16,128], index: 5, kind: output, shape index: {}]  }
   0x1   :  { %11 = vsyncpa [#allocation6], 0  ;;  %s463_s18 = smov [#allocation3]   ;;  %s415_s22 = scalar_lea.hbm %s539_s1, 1024 }
   0x2   :  { %s19_s19 = sshll.u32 %s463_s18, 4  ;;  %p416_p0 = scmp.ne.s32.totalorder %s539_s1, %s415_s22  ;;  %s20_s19 = int_to_ptr.vmem [resolvable:$true] %s19_s19 }
   0x3   :  { %p419_p1 = scmp.lt.u32.totalorder %s415_s22, %s539_s1 }
   0x5   :  { %p421_p2 = pnand %p419_p1, %p416_p0 }
   0x7   :  { %424 = shalt.err (!%p421_p2)
}
   0x8   :  { %s425_s27 = scalar_lea.vmem %s20_s19, 1024  ;;  %p430_p4 = scmp.lt.s32.totalorder %s20_s19, %s20_s19 }
   0x9   :  { %p426_p3 = scmp.ne.s32.totalorder %s20_s19, %s425_s27  ;;  %p431_p5 = scmp.lt.s32.totalorder %s425_s27, %s425_s27 }
   0xb   :  { %p432_p6 = por %p431_p5, %p430_p4 }
   0xd   :  { %p433_p7 = pnand %p432_p6, %p426_p3 }
   0xf   :  { %436 = shalt.err (!%p433_p7)
}
  0x10   :  { %s464_s28 = smov 64   ;;  %s465_s29 = smov 4  }
  0x11   :  { %25 = dma.hbm_to_vmem [thread:$0]  %s539_s1, 1024, %s20_s19, [#allocation4], %s464_s28, %s464_s28, %s465_s29  }
  0x12   :  { %s466_s7 = smov [#allocation5]   ;;  %s437_s11 = scalar_lea.hbm %s541_s3, 1024 }
  0x13   :  { %s33_s8 = sshll.u32 %s466_s7, 4  ;;  %p438_p8 = scmp.ne.s32.totalorder %s541_s3, %s437_s11  ;;  %s34_s8 = int_to_ptr.vmem [resolvable:$true] %s33_s8 }
  0x14   :  { %p441_p9 = scmp.lt.u32.totalorder %s437_s11, %s541_s3 }
  0x16   :  { %p443_p10 = pnand %p441_p9, %p438_p8 }
  0x18   :  { %446 = shalt.err (!%p443_p10)
}
  0x19   :  { %s447_s16 = scalar_lea.vmem %s34_s8, 1024  ;;  %p452_p12 = scmp.lt.s32.totalorder %s34_s8, %s34_s8 }
  0x1a   :  { %p448_p11 = scmp.ne.s32.totalorder %s34_s8, %s447_s16  ;;  %p453_p13 = scmp.lt.s32.totalorder %s447_s16, %s447_s16 }
  0x1c   :  { %p454_p0 = por %p453_p13, %p452_p12 }
  0x1e   :  { %p455_p1 = pnand %p454_p0, %p448_p11 }
  0x20   :  { %458 = shalt.err (!%p455_p1)
}
  0x21   :  { %39 = dma.hbm_to_vmem [thread:$0]  %s541_s3, 1024, %s34_s8, [#allocation6], %s464_s28, %s464_s28, %s465_s29  }
  0x22   :  { %459 = dma.done.wait [#allocation4], 1024  }
  0x23   :  { %460 = vsyncadd [#allocation4], 4294966272 }
  0x24   :  { %461 = dma.done.wait [#allocation6], 1024  }
  0x25   :  { %462 = vsyncadd [#allocation6], 4294966272  ;;  %v467_v0 = vmov 0.0   ;;  %vm468_vm0 = vmmov 0   ;;  %v398_v1 = vld [vmem:[#allocation3] sm:$0xff]   ;;  %v399_v2 = vld [vmem:[#allocation3 + $0x8] sm:$0xff]  }
  0x26   :  { %352 = vmatprep.subr.bf16.mxu0 %v467_v0  ;;  %368 = vmatprep.mubr.msk.bf16.mxu0 %vm468_vm0, %v467_v0  ;;  %v400_v3 = vld [vmem:[#allocation3 + $0x10] sm:$0xff]   ;;  %v407_v4 = vld [vmem:[#allocation5] sm:$0xff]   ;;  %v401_v5 = vld [vmem:[#allocation3 + $0x18] sm:$0xff]  }
  0x27   :  { %372 = vmatprep.subr.bf16.mxu1 %v467_v0  ;;  %388 = vmatprep.mubr.msk.bf16.mxu1 %vm468_vm0, %v467_v0  ;;  %v408_v6 = vld [vmem:[#allocation5 + $0x8] sm:$0xff]   ;;  %v402_v7 = vld [vmem:[#allocation3 + $0x20] sm:$0xff]   ;;  %v409_v8 = vld [vmem:[#allocation5 + $0x10] sm:$0xff]  }
  0x28   :  { %353 = vmatpush3.bf16.msra.mxu0 %v398_v1  ;;  %373 = vmatpush3.bf16.msra.mxu1 %v407_v4  ;;  %v403_v9 = vld [vmem:[#allocation3 + $0x28] sm:$0xff]   ;;  %v410_v10 = vld [vmem:[#allocation5 + $0x18] sm:$0xff]   ;;  %v404_v11 = vld [vmem:[#allocation3 + $0x30] sm:$0xff]  }
  0x29   :  { %354 = vmatprep.subr.bf16.mxu0 %v467_v0  ;;  %374 = vmatprep.subr.bf16.mxu1 %v467_v0  ;;  %v411_v12 = vld [vmem:[#allocation5 + $0x20] sm:$0xff]   ;;  %v405_v13 = vld [vmem:[#allocation3 + $0x38] sm:$0xff]   ;;  %v412_v14 = vld [vmem:[#allocation5 + $0x28] sm:$0xff]  }
  0x2a   :  { %v406_v15 = vld [vmem:[%s538_s0] sm:$0xff]   ;;  %v413_v16 = vld [vmem:[#allocation5 + $0x30] sm:$0xff]   ;;  %v414_v17 = vld [vmem:[#allocation5 + $0x38] sm:$0xff]  }
  0x2b   :  { %v324_v18 = vld [vmem:[%s540_s2] ss:$0 sm:$0xff] }
  0x2c   :  { %355 = vmatpush3.bf16.msra.mxu0 %v399_v2  ;;  %375 = vmatpush3.bf16.msra.mxu1 %v408_v6  ;;  %v325_v28 = vld [vmem:[%s542_s4] ss:$0 sm:$0xff] }
  0x2d   :  { %356 = vmatprep.subr.bf16.mxu0 %v467_v0  ;;  %376 = vmatprep.subr.bf16.mxu1 %v467_v0 }
  0x30   :  { %357 = vmatpush3.bf16.msra.mxu0 %v400_v3  ;;  %377 = vmatpush3.bf16.msra.mxu1 %v409_v8 }
  0x31   :  { %358 = vmatprep.subr.bf16.mxu0 %v467_v0  ;;  %378 = vmatprep.subr.bf16.mxu1 %v467_v0 }
  0x34   :  { %359 = vmatpush3.bf16.msra.mxu0 %v401_v5  ;;  %379 = vmatpush3.bf16.msra.mxu1 %v410_v10 }
  0x35   :  { %360 = vmatprep.subr.bf16.mxu0 %v467_v0  ;;  %380 = vmatprep.subr.bf16.mxu1 %v467_v0 }
  0x38   :  { %361 = vmatpush3.bf16.msra.mxu0 %v402_v7  ;;  %381 = vmatpush3.bf16.msra.mxu1 %v411_v12 }
  0x39   :  { %362 = vmatprep.subr.bf16.mxu0 %v467_v0  ;;  %382 = vmatprep.subr.bf16.mxu1 %v467_v0 }
  0x3c   :  { %363 = vmatpush3.bf16.msra.mxu0 %v403_v9  ;;  %383 = vmatpush3.bf16.msra.mxu1 %v412_v14 }
  0x3d   :  { %364 = vmatprep.subr.bf16.mxu0 %v467_v0  ;;  %384 = vmatprep.subr.bf16.mxu1 %v467_v0 }
  0x40   :  { %365 = vmatpush3.bf16.msra.mxu0 %v404_v11  ;;  %385 = vmatpush3.bf16.msra.mxu1 %v413_v16 }
  0x41   :  { %366 = vmatprep.subr.bf16.mxu0 %v467_v0  ;;  %386 = vmatprep.subr.bf16.mxu1 %v467_v0 }
  0x44   :  { %367 = vmatpush3.bf16.msra.mxu0 %v405_v13  ;;  %387 = vmatpush3.bf16.msra.mxu1 %v414_v17 }
  0x47   :  { %369 = vmatmul.mubr.bf16.vlgmr.msra.gmra.mrb[0].mxu0 %v406_v15 }
 0x11a   :  { %v155_v19 = vpop.f32.mrb[0].mxu0 }
 0x11b   :  { %v190_v20 = vadd.f32 %v324_v18, %v155_v19  ;;  %v370_v21 = vpop.f32.mrb[1].mxu0 }
 0x11c   :  { %v158_v22 = vpop.f32.mrb[2].mxu0 }
 0x11d   :  { %v191_v23 = vadd.f32 %v324_v18, %v158_v22  ;;  %v371_v24 = vpop.f32.mrb[3].mxu0  ;;  %v192_v25 = vmax.f32 %v190_v20, 0.0 }
 0x11f   :  { %v193_v26 = vmax.f32 %v191_v23, 0.0 }
 0x121   :  { %v194_v27 = vpack.c.bf16 %v193_v26, %v192_v25 }
 0x123   :  { %389 = vmatmul.mubr.bf16.vlgmr.msra.gmra.mrb[0].mxu1 %v194_v27 }
 0x1f6   :  { %v300_v29 = vpop.f32.mrb[0].mxu1 }
 0x1f7   :  { %v301_v30 = vadd.f32 %v325_v28, %v300_v29  ;;  %v390_v31 = vpop.f32.mrb[1].mxu1 }
 0x1f8   :  { %v303_v32 = vpop.f32.mrb[2].mxu1 }
 0x1f9   :  { %307 = vst [vmem:[%s543_s5] sm:$0xff] %v301_v30  ;;  %v304_v33 = vadd.f32 %v325_v28, %v303_v32  ;;  %v391_v34 = vpop.f32.mrb[3].mxu1 }
 0x1fb   :  { %308 = vst [vmem:[%s543_s5 + $0x8] sm:$0xff] %v304_v33 }
 0x1fc   :  { %313 = vsyncpa [#allocation4], 1 }
 0x1fd   :  { %314 = vsyncpa [#allocation6], 1 }

</bundles_post_ra>
